<compile_context>
chip_gen: v7x
topology: tpu7x:2x2x1
jax: 0.10.0
libtpu: 0.0.40
codegen_flags: <defaults>
</compile_context>

<pallas_src>
import jax
import jax.numpy as jnp
import numpy as np
from jax.experimental import pallas as pl
from jax.experimental.pallas import tpu as pltpu


def spv_head_kernel(first_l_ref, last_l_ref, first_r_ref, last_r_ref,
                    segs_ls_ref, segs_rs_ref,
                    w_comb_ref, b_comb_ref,
                    out_ref):
    f32 = jnp.float32
    S = first_l_ref.shape[1]
    half_inv_S = jnp.float32(0.5 / S)   # folds first_last_avg's /2 and mean's /S

    # Activations may arrive bf16 (HBM/DMA format); upcast right after load so
    # all VPU math is f32 (v5e has no bf16 VPU path; on v6e/v7x the cast is
    # free filler under the HBM-bound roofline).
    sum_l = first_l_ref[...].astype(f32) + last_l_ref[...].astype(f32)    # [TB,S,D]
    sum_r = first_r_ref[...].astype(f32) + last_r_ref[...].astype(f32)    # [TB,S,D]

    # Pre-scaled masks on the tiny [TB,1,S] segment tensors.
    ones = jnp.full(segs_ls_ref.shape, half_inv_S, f32)                   # [TB,1,S]
    tar = (segs_ls_ref[...] == 1).astype(f32) * half_inv_S                # [TB,1,S]
    pos = (segs_rs_ref[...] == 3).astype(f32) * half_inv_S                # [TB,1,S]
    masks_l = jnp.concatenate((ones, tar), axis=1)                        # [TB,2,S]

    # Sequence reductions on the MXU (batched matmuls against the masks)
    # instead of VPU multiplies + XLU sublane reductions.
    hc_ht = jnp.einsum('bms,bsd->bmd', masks_l, sum_l,
                       preferred_element_type=f32)                        # [TB,2,D]
    h_p = jnp.einsum('bms,bsd->bmd', pos, sum_r,
                     preferred_element_type=f32)[:, 0, :]                 # [TB,D]
    h_c = hc_ht[:, 0, :]                                                  # [TB,D]
    h_t = hc_ht[:, 1, :]                                                  # [TB,D]

    # cat_abs_dot features + h_p; lane-axis concat rides the idle XLU slot.
    feats = jnp.concatenate(
        (h_c, h_t, jnp.abs(h_c - h_t), h_c * h_t, h_p), axis=-1)          # [TB,5D]

    # Single fused (SPV_linear o fc) matmul against the pre-composed,
    # lane-padded weight; output block is lane-dense [TB, C_pad].
    out_ref[...] = (jnp.dot(feats, w_comb_ref[...],
                            preferred_element_type=f32)
                    + b_comb_ref[...])                                    # [TB,C_pad]


def prepare_spv_weights(w_spv, b_spv, w_fc, b_fc, *, lane_pad=128):
    """One-time layout prep (NOT on the per-call path).

    Composes SPV_linear and fc into a single weight/bias — exact in eval mode
    since no nonlinearity or dropout sits between them — transposes PyTorch
    [out, in] weights to [in, out], and zero-pads the output columns to a
    multiple of 128 so the kernel's output store is an unmasked, lane-dense
    vst.  The padded columns are exact zeros and are sliced off by the
    wrapper.
    """
    D = w_spv.shape[0]          # SPV_linear weight: [D, 4D]  (PyTorch [out, in])
    C = w_fc.shape[0]           # fc weight:         [C, 2D]
    hi = jax.lax.Precision.HIGHEST
    w_spv_t = jnp.transpose(w_spv).astype(jnp.float32)                    # [4D, D]
    w_fc_t = jnp.transpose(w_fc).astype(jnp.float32)                      # [2D, C]
    w_top = jnp.matmul(w_spv_t, w_fc_t[:D, :], precision=hi)              # [4D, C]
    w_comb = jnp.concatenate((w_top, w_fc_t[D:, :]), axis=0)              # [5D, C]
    b_comb = (jnp.matmul(b_spv.reshape(1, D).astype(jnp.float32),
                         w_fc_t[:D, :], precision=hi)
              + b_fc.reshape(1, C).astype(jnp.float32))                   # [1, C]
    C_pad = ((C + lane_pad - 1) // lane_pad) * lane_pad
    w_pad = jnp.pad(w_comb, ((0, 0), (0, C_pad - C)))                     # [5D, C_pad]
    b_pad = jnp.pad(b_comb, ((0, 0), (0, C_pad - C)))                     # [1, C_pad]
    return w_pad, b_pad


def _default_batch_tile(B, S, D, act_itemsize, vmem_budget_bytes=24 << 20):
    """Pick the batch tile: large enough to amortize the ~0.35 us per-step
    overhead, small enough that the double-buffered activation + seg blocks
    stay under ~24 MiB (fits v7x's 32 MiB scoped default of 64 MiB physical
    VMEM), and never the full batch so the parallel grid axis has >= 2 steps
    (keeps both v7x TensorCores busy)."""
    per_batch = 2 * (4 * S * D * act_itemsize + 2 * S * 4)   # double-buffered HBM blocks
    cap = max(1, vmem_budget_bytes // per_batch)
    tb = int(max(1, min(cap, max(1, B // 2))))
    while B % tb:
        tb -= 1
    return tb


def spv_head(first_l, last_l, first_r, last_r, segs_ls, segs_rs,
             w_comb_pad, b_comb_pad, *, num_classes, batch_tile=None):
    """SPV head forward. Weights must come from prepare_spv_weights."""
    B, S, D = first_l.shape
    C_pad = w_comb_pad.shape[1]
    assert w_comb_pad.shape[0] == 5 * D and C_pad % 128 == 0
    act_itemsize = jnp.dtype(first_l.dtype).itemsize

    if batch_tile is None:
        TB = _default_batch_tile(B, S, D, act_itemsize)
    else:
        TB = max(1, min(int(batch_tile), B))
        while B % TB:
            TB -= 1
    grid = (B // TB,)

    # [B, S] -> [B, 1, S] so seg blocks keep full last-two dims at any TB.
    segs_ls3 = segs_ls.reshape(B, 1, S).astype(jnp.int32)
    segs_rs3 = segs_rs.reshape(B, 1, S).astype(jnp.int32)

    act_spec = pl.BlockSpec((TB, S, D), lambda i: (i, 0, 0))
    seg_spec = pl.BlockSpec((TB, 1, S), lambda i: (i, 0, 0))
    # Constant block index -> weights/biases DMA'd once, resident thereafter.
    w_spec = pl.BlockSpec((5 * D, C_pad), lambda i: (0, 0))
    b_spec = pl.BlockSpec((1, C_pad), lambda i: (0, 0))
    out_spec = pl.BlockSpec((None, TB, C_pad), lambda i: (i, 0, 0))

    # Advisory cost estimate so XLA overlaps this small call with PLM ops.
    flops = 2 * B * 3 * S * D + 2 * B * (5 * D) * C_pad + 6 * B * S * D
    bytes_accessed = (4 * B * S * D * act_itemsize + 2 * B * S * 4
                      + (w_comb_pad.size + b_comb_pad.size) * 4
                      + B * C_pad * 4)
    cost = pl.CostEstimate(flops=int(flops), transcendentals=0,
                           bytes_accessed=int(bytes_accessed))

    # Raise the scoped-VMEM limit only when the working set exceeds the
    # tightest per-generation default (v5e: 16 MiB); cap with headroom for
    # v7x's 64 MiB physical VMEM.
    vmem_est = (2 * (4 * TB * S * D * act_itemsize + 2 * TB * S * 4)
                + (w_comb_pad.size + b_comb_pad.size) * 4
                + 2 * TB * C_pad * 4
                + 6 * TB * S * D * 4)
    cp_kwargs = dict(dimension_semantics=("parallel",))
    if vmem_est > (16 << 20):
        cp_kwargs["vmem_limit_bytes"] = int(min(vmem_est * 2, 48 << 20))

    out = pl.pallas_call(
        spv_head_kernel,
        out_shape=jax.ShapeDtypeStruct((B // TB, TB, C_pad), jnp.float32),
        grid=grid,
        in_specs=[act_spec, act_spec, act_spec, act_spec,
                  seg_spec, seg_spec, w_spec, b_spec],
        out_specs=out_spec,
        compiler_params=pltpu.CompilerParams(**cp_kwargs),
        cost_estimate=cost,
    )(first_l, last_l, first_r, last_r, segs_ls3, segs_rs3,
      w_comb_pad, b_comb_pad)

    # Lane-dense padded columns are exact zeros; drop them outside the kernel.
    return out.reshape(B, C_pad)[:, :num_classes]


def spv_head_ref(first_l, last_l, first_r, last_r, segs_ls, segs_rs,
                 w_spv, b_spv, w_fc, b_fc):
    """Pure-JAX reference mirroring the PyTorch forward (eval mode)."""
    embed_l = (first_l + last_l) / 2.0
    embed_r = (first_r + last_r) / 2.0
    tar_mask = (segs_ls == 1).astype(jnp.float32)
    H_t = tar_mask[:, :, None] * embed_l
    h_c = jnp.mean(embed_l, axis=1)
    h_t = jnp.mean(H_t, axis=1)
    h_spv = jnp.concatenate((h_c, h_t, jnp.abs(h_c - h_t), h_c * h_t), axis=-1)
    h_spv = h_spv @ w_spv.T + b_spv
    pos_mask = (segs_rs == 3).astype(jnp.float32)
    H_p = pos_mask[:, :, None] * embed_r
    h_p = jnp.mean(H_p, axis=1)
    final = jnp.concatenate((h_spv, h_p), axis=-1)
    return final @ w_fc.T + b_fc


if __name__ == "__main__":
    B, S, D, C = 2, 8, 32, 4            # batch, seq, embed_dim, num_classes
    initializer_range = 0.02

    key = jax.random.PRNGKey(0)
    (k_fl, k_ll, k_fr, k_lr, k_sl, k_sr,
     k_wspv, k_wfc, k_bspv, k_bfc) = jax.random.split(key, 10)

    # Synthetic PLM hidden states (hidden_states[1] and hidden_states[-1]).
    first_l = jax.random.normal(k_fl, (B, S, D), jnp.float32)
    last_l = jax.random.normal(k_ll, (B, S, D), jnp.float32)
    first_r = jax.random.normal(k_fr, (B, S, D), jnp.float32)
    last_r = jax.random.normal(k_lr, (B, S, D), jnp.float32)

    # Segment ids: left in {0,1} (1 marks target span), right in {0,3}.
    segs_ls = jax.random.randint(k_sl, (B, S), 0, 2, jnp.int32)
    segs_rs = jnp.where(jax.random.randint(k_sr, (B, S), 0, 2, jnp.int32) == 1,
                        jnp.int32(3), jnp.int32(0))

    # Weights N(0, 0.02) per _init_weights.  Biases are zero at init; small
    # non-zero values are used here so the fused-bias path is exercised.
    w_spv = initializer_range * jax.random.normal(k_wspv, (D, 4 * D), jnp.float32)
    b_spv = 0.01 * jax.random.normal(k_bspv, (D,), jnp.float32)
    w_fc = initializer_range * jax.random.normal(k_wfc, (C, 2 * D), jnp.float32)
    b_fc = 0.01 * jax.random.normal(k_bfc, (C,), jnp.float32)

    # One-time weight composition / layout prep (off the per-call path).
    w_comb, b_comb = jax.block_until_ready(
        prepare_spv_weights(w_spv, b_spv, w_fc, b_fc))

    ref = spv_head_ref(first_l, last_l, first_r, last_r, segs_ls, segs_rs,
                       w_spv, b_spv, w_fc, b_fc)

    # f32 activation path.
    out_f32 = jax.block_until_ready(
        spv_head(first_l, last_l, first_r, last_r, segs_ls, segs_rs,
                 w_comb, b_comb, num_classes=C))
    np.testing.assert_allclose(np.asarray(out_f32), np.asarray(ref),
                               rtol=1e-3, atol=5e-4)

    # bf16 activation storage (halves HBM bytes on v6e/v7x; kernel upcasts
    # on load so the same kernel is correct on v5e as well).
    bf16 = jnp.bfloat16
    out_bf16 = jax.block_until_ready(
        spv_head(first_l.astype(bf16), last_l.astype(bf16),
                 first_r.astype(bf16), last_r.astype(bf16),
                 segs_ls, segs_rs, w_comb, b_comb, num_classes=C))
    np.testing.assert_allclose(np.asarray(out_bf16), np.asarray(ref),
                               rtol=5e-2, atol=1e-2)

    print("KERNEL_OK")
</pallas_src>

<mosaic_0001>
module attributes {stable_mosaic.version = 11 : i64} {
  func.func @spv_head_kernel(%arg0: i32, %arg1: memref<1x8x32xf32, #tpu.memory_space<vmem>>, %arg2: memref<1x8x32xf32, #tpu.memory_space<vmem>>, %arg3: memref<1x8x32xf32, #tpu.memory_space<vmem>>, %arg4: memref<1x8x32xf32, #tpu.memory_space<vmem>>, %arg5: memref<1x1x8xi32, #tpu.memory_space<vmem>>, %arg6: memref<1x1x8xi32, #tpu.memory_space<vmem>>, %arg7: memref<160x128xf32, #tpu.memory_space<vmem>>, %arg8: memref<1x128xf32, #tpu.memory_space<vmem>>, %arg9: memref<1x1x128xf32, #tpu.memory_space<vmem>>) attributes {dimension_semantics = [#tpu.dimension_semantics<parallel>], iteration_bounds = array<i64: 2>, scalar_prefetch = 0 : i64, scratch_operands = 0 : i64, tpu.core_type = #tpu.core_type<tc>, window_params = [{transform_indices = @transform_0, window_bounds = array<i64: 1, 8, 32>}, {transform_indices = @transform_1, window_bounds = array<i64: 1, 8, 32>}, {transform_indices = @transform_2, window_bounds = array<i64: 1, 8, 32>}, {transform_indices = @transform_3, window_bounds = array<i64: 1, 8, 32>}, {transform_indices = @transform_4, window_bounds = array<i64: 1, 1, 8>}, {transform_indices = @transform_5, window_bounds = array<i64: 1, 1, 8>}, {pipeline_mode = #tpu.pipeline_mode<synchronous>, transform_indices = @transform_6, window_bounds = array<i64: 160, 128>}, {pipeline_mode = #tpu.pipeline_mode<synchronous>, transform_indices = @transform_7, window_bounds = array<i64: 1, 128>}, {transform_indices = @transform_8, window_bounds = array<i64: 1, 1, 128>}]} {
    %c0 = arith.constant 0 : index
    %c0_0 = arith.constant 0 : index
    %c0_1 = arith.constant 0 : index
    %0 = vector.load %arg1[%c0, %c0_0, %c0_1] : memref<1x8x32xf32, #tpu.memory_space<vmem>>, vector<1x8x32xf32>
    %c0_2 = arith.constant 0 : index
    %c0_3 = arith.constant 0 : index
    %c0_4 = arith.constant 0 : index
    %1 = vector.load %arg2[%c0_2, %c0_3, %c0_4] : memref<1x8x32xf32, #tpu.memory_space<vmem>>, vector<1x8x32xf32>
    %2 = arith.addf %0, %1 : vector<1x8x32xf32>
    %c0_5 = arith.constant 0 : index
    %c0_6 = arith.constant 0 : index
    %c0_7 = arith.constant 0 : index
    %3 = vector.load %arg3[%c0_5, %c0_6, %c0_7] : memref<1x8x32xf32, #tpu.memory_space<vmem>>, vector<1x8x32xf32>
    %c0_8 = arith.constant 0 : index
    %c0_9 = arith.constant 0 : index
    %c0_10 = arith.constant 0 : index
    %4 = vector.load %arg4[%c0_8, %c0_9, %c0_10] : memref<1x8x32xf32, #tpu.memory_space<vmem>>, vector<1x8x32xf32>
    %5 = arith.addf %3, %4 : vector<1x8x32xf32>
    %cst = arith.constant 6.250000e-02 : f32
    %6 = vector.broadcast %cst : f32 to vector<1x1x8xf32>
    %c0_11 = arith.constant 0 : index
    %c0_12 = arith.constant 0 : index
    %c0_13 = arith.constant 0 : index
    %7 = vector.load %arg5[%c0_11, %c0_12, %c0_13] : memref<1x1x8xi32, #tpu.memory_space<vmem>>, vector<1x1x8xi32>
    %c1_i32 = arith.constant 1 : i32
    %8 = vector.broadcast %c1_i32 : i32 to vector<1x1x8xi32>
    %9 = arith.cmpi eq, %7, %8 : vector<1x1x8xi32>
    %10 = arith.extui %9 : vector<1x1x8xi1> to vector<1x1x8xi32>
    %11 = arith.sitofp %10 : vector<1x1x8xi32> to vector<1x1x8xf32>
    %cst_14 = arith.constant 6.250000e-02 : f32
    %12 = vector.broadcast %cst_14 : f32 to vector<1x1x8xf32>
    %13 = arith.mulf %11, %12 : vector<1x1x8xf32>
    %c0_15 = arith.constant 0 : index
    %c0_16 = arith.constant 0 : index
    %c0_17 = arith.constant 0 : index
    %14 = vector.load %arg6[%c0_15, %c0_16, %c0_17] : memref<1x1x8xi32, #tpu.memory_space<vmem>>, vector<1x1x8xi32>
    %c3_i32 = arith.constant 3 : i32
    %15 = vector.broadcast %c3_i32 : i32 to vector<1x1x8xi32>
    %16 = arith.cmpi eq, %14, %15 : vector<1x1x8xi32>
    %17 = arith.extui %16 : vector<1x1x8xi1> to vector<1x1x8xi32>
    %18 = arith.sitofp %17 : vector<1x1x8xi32> to vector<1x1x8xf32>
    %cst_18 = arith.constant 6.250000e-02 : f32
    %19 = vector.broadcast %cst_18 : f32 to vector<1x1x8xf32>
    %20 = arith.mulf %18, %19 : vector<1x1x8xf32>
    %21 = tpu.concatenate %6, %13 in 1 : vector<1x1x8xf32>, vector<1x1x8xf32> -> vector<1x2x8xf32>
    "tpu.trace_start"() <{level = 10 : i32, message = "bms,bsd->bmd"}> : () -> ()
    %cst_19 = arith.constant dense<0.000000e+00> : vector<1x2x32xf32>
    %22 = tpu.matmul %21, %2, %cst_19 {dimension_numbers = #tpu.dot_dimension_numbers<[2], [1], [1], [2], [0, 0, 0, 1, 1, 2], [0], [0]>} : vector<1x2x8xf32>, vector<1x8x32xf32>, vector<1x2x32xf32> -> vector<1x2x32xf32>
    %cst_20 = arith.constant dense<0.000000e+00> : vector<1x1x32xf32>
    %23 = tpu.matmul %20, %5, %cst_20 {dimension_numbers = #tpu.dot_dimension_numbers<[2], [1], [1], [2], [0, 0, 0, 1, 1, 2], [0], [0]>} : vector<1x1x8xf32>, vector<1x8x32xf32>, vector<1x1x32xf32> -> vector<1x1x32xf32>
    "tpu.trace_stop"() : () -> ()
    %24 = vector.shape_cast %23 : vector<1x1x32xf32> to vector<1x32xf32>
    %25 = vector.extract_strided_slice %22 {offsets = [0, 0, 0], sizes = [1, 1, 32], strides = [1, 1, 1]} : vector<1x2x32xf32> to vector<1x1x32xf32>
    %26 = vector.shape_cast %25 : vector<1x1x32xf32> to vector<1x32xf32>
    %27 = vector.extract_strided_slice %22 {offsets = [0, 1, 0], sizes = [1, 1, 32], strides = [1, 1, 1]} : vector<1x2x32xf32> to vector<1x1x32xf32>
    %28 = vector.shape_cast %27 : vector<1x1x32xf32> to vector<1x32xf32>
    %29 = arith.subf %26, %28 : vector<1x32xf32>
    %30 = math.absf %29 : vector<1x32xf32>
    %31 = arith.mulf %26, %28 : vector<1x32xf32>
    %32 = tpu.concatenate %26, %28, %30, %31, %24 in 1 : vector<1x32xf32>, vector<1x32xf32>, vector<1x32xf32>, vector<1x32xf32>, vector<1x32xf32> -> vector<1x160xf32>
    %c0_21 = arith.constant 0 : index
    %c0_22 = arith.constant 0 : index
    %33 = vector.load %arg7[%c0_21, %c0_22] : memref<160x128xf32, #tpu.memory_space<vmem>>, vector<160x128xf32>
    %cst_23 = arith.constant dense<0.000000e+00> : vector<1x128xf32>
    %34 = tpu.matmul %32, %33, %cst_23 {dimension_numbers = #tpu.dot_dimension_numbers<[1], [0], [0], [1], [0, 0, 1, 1], [], []>} : vector<1x160xf32>, vector<160x128xf32>, vector<1x128xf32> -> vector<1x128xf32>
    %c0_24 = arith.constant 0 : index
    %c0_25 = arith.constant 0 : index
    %35 = vector.load %arg8[%c0_24, %c0_25] : memref<1x128xf32, #tpu.memory_space<vmem>>, vector<1x128xf32>
    %36 = arith.addf %34, %35 : vector<1x128xf32>
    %c0_26 = arith.constant 0 : index
    %c0_27 = arith.constant 0 : index
    %c0_28 = arith.constant 0 : index
    %37 = vector.load %arg9[%c0_26, %c0_27, %c0_28] : memref<1x1x128xf32, #tpu.memory_space<vmem>>, vector<1x1x128xf32>
    %38 = vector.shape_cast %37 : vector<1x1x128xf32> to vector<1x128xf32>
    %39 = vector.shape_cast %36 : vector<1x128xf32> to vector<1x1x128xf32>
    tpu.vector_store %arg9[%c0_26, %c0_27, %c0_28], %39 {strides = array<i32>} : memref<1x1x128xf32, #tpu.memory_space<vmem>>, vector<1x1x128xf32>,
    return
  }
  func.func @transform_0(%arg0: i32) -> (i32, i32, i32) {
    %c0_i32 = arith.constant 0 : i32
    %c0_i32_0 = arith.constant 0 : i32
    %c0_i32_1 = arith.constant 0 : i32
    return %arg0, %c0_i32, %c0_i32_0 : i32, i32, i32
  }
  func.func @transform_1(%arg0: i32) -> (i32, i32, i32) {
    %c0_i32 = arith.constant 0 : i32
    %c0_i32_0 = arith.constant 0 : i32
    %c0_i32_1 = arith.constant 0 : i32
    return %arg0, %c0_i32, %c0_i32_0 : i32, i32, i32
  }
  func.func @transform_2(%arg0: i32) -> (i32, i32, i32) {
    %c0_i32 = arith.constant 0 : i32
    %c0_i32_0 = arith.constant 0 : i32
    %c0_i32_1 = arith.constant 0 : i32
    return %arg0, %c0_i32, %c0_i32_0 : i32, i32, i32
  }
  func.func @transform_3(%arg0: i32) -> (i32, i32, i32) {
    %c0_i32 = arith.constant 0 : i32
    %c0_i32_0 = arith.constant 0 : i32
    %c0_i32_1 = arith.constant 0 : i32
    return %arg0, %c0_i32, %c0_i32_0 : i32, i32, i32
  }
  func.func @transform_4(%arg0: i32) -> (i32, i32, i32) {
    %c0_i32 = arith.constant 0 : i32
    %c0_i32_0 = arith.constant 0 : i32
    %c0_i32_1 = arith.constant 0 : i32
    return %arg0, %c0_i32, %c0_i32_0 : i32, i32, i32
  }
  func.func @transform_5(%arg0: i32) -> (i32, i32, i32) {
    %c0_i32 = arith.constant 0 : i32
    %c0_i32_0 = arith.constant 0 : i32
    %c0_i32_1 = arith.constant 0 : i32
    return %arg0, %c0_i32, %c0_i32_0 : i32, i32, i32
  }
  func.func @transform_6(%arg0: i32) -> (i32, i32) {
    %c0_i32 = arith.constant 0 : i32
    %c0_i32_0 = arith.constant 0 : i32
    %c0_i32_1 = arith.constant 0 : i32
    return %c0_i32, %c0_i32_0 : i32, i32
  }
  func.func @transform_7(%arg0: i32) -> (i32, i32) {
    %c0_i32 = arith.constant 0 : i32
    %c0_i32_0 = arith.constant 0 : i32
    %c0_i32_1 = arith.constant 0 : i32
    return %c0_i32, %c0_i32_0 : i32, i32
  }
  func.func @transform_8(%arg0: i32) -> (i32, i32, i32) {
    %c0_i32 = arith.constant 0 : i32
    %c0_i32_0 = arith.constant 0 : i32
    %c0_i32_1 = arith.constant 0 : i32
    return %arg0, %c0_i32, %c0_i32_0 : i32, i32, i32
  }
}

</mosaic_0001>

<bundles_post_ra>
// kernel: tpu_custom_call.1
= control target key start
LH: loop header
LB: loop body
LE: loop exit
PB: predicated region body
PF: predicated region fallthrough
CT: control target
= control target key end

     0   :  { %s1686_s0 = inlined_call_operand.hbm [shape: f32[2,8,32], index: 0, kind: input, shape index: {}]   ;;  %s1687_s1 = inlined_call_operand.hbm [shape: f32[2,8,32], index: 1, kind: input, shape index: {}]   ;;  %s1688_s2 = inlined_call_operand.hbm [shape: f32[2,8,32], index: 2, kind: input, shape index: {}]   ;;  %s1689_s3 = inlined_call_operand.hbm [shape: f32[2,8,32], index: 3, kind: input, shape index: {}]   ;;  %s1690_s4 = inlined_call_operand.vmem [shape: s32[2,1,8], index: 4, kind: input, shape index: {}]   ;;  %s1691_s5 = inlined_call_operand.vmem [shape: s32[2,1,8], index: 5, kind: input, shape index: {}]   ;;  %s1692_s6 = inlined_call_operand.hbm [shape: f32[160,128], index: 6, kind: input, shape index: {}]   ;;  %s1693_s7 = inlined_call_operand.vmem [shape: f32[1,128], index: 7, kind: input, shape index: {}]   ;;  %s1694_s8 = inlined_call_operand.hbm [shape: f32[2,1,128], index: 8, kind: output, shape index: {}]  }
   0x1   :  { %1707 = sst [smem:[#allocation21_spill]] %s1687_s1 }
   0x2   :  { %1708 = sst [smem:[#allocation22_spill]] %s1692_s6 }
   0x3   :  { %13 = vsyncpa [#allocation3], 0 }
   0x4   :  { %15 = vsyncpa [#allocation3 + $0x1], 0 }
   0x5   :  { %16 = vsyncpa [#allocation6], 0 }
   0x6   :  { %18 = vsyncpa [#allocation6 + $0x1], 0 }
   0x7   :  { %19 = vsyncpa [#allocation9], 0 }
   0x8   :  { %21 = vsyncpa [#allocation9 + $0x1], 0 }
   0x9   :  { %22 = vsyncpa [#allocation4], 0 }
   0xa   :  { %24 = vsyncpa [#allocation4 + $0x1], 0  ;;  %s1368_s27 = smov 0   ;;  %s1370_s28 = smov 0  }
   0xb   :  { %s1372_s29 = smov 0   ;;  %s1374_s30 = smov 0  }
   0xc LB: > { %1709 = sst [smem:[#allocation17_spill]] %s1303_s29  ;;  %s1389_s9 = sadd.s32 4294967295, %s1307_s30   ;;  %s1307_s30 = sphi %s1374_s30, %s1736_s30   ;;  %s1303_s29 = sphi %s1372_s29, %s1738_s29   ;;  %s1299_s28 = sphi %s1370_s28, %s1740_s28   ;;  %s1295_s27 = sphi %s1368_s27, %s1739_s27  }
   0xd   : > { %s931_s10 = sadd.s32 4294967294, %s1307_s30   ;;  %p50_p0 = scmp.ne.s32.totalorder %s1299_s28, %s1295_s27 }
   0xe   : > { %p1695_p1 = scmp.eq.s32.totalorder %s1389_s9, 0  ;;  %p252_p3 = scmp.eq.s32.totalorder %s931_s10, 1 }
   0xf   : > { %p932_p5 = scmp.ge.s32.totalorder %s1307_s30, 1  ;;  %p259_p7 = scmp.lt.s32.totalorder %s1307_s30, 3 }
  0x10   : > { %p1398_p4 = por %p1695_p1, %p50_p0  ;;  %p1403_p6 = por %p252_p3, %p50_p0 }
  0x11   : > { %p1408_p8 = pnand %p932_p5, %p259_p7  ;;  %s1309_s14 = smov [#allocation10]  }
  0x12   : > { %s1710_s11 = scalar_select %p1398_p4, 1, 0 }
  0x13   : > { %s1711_s12 = scalar_select %p1403_p6, 1, 0 }
  0x14   : > { %s1713_s13 = scalar_select %p1408_p8, 1, 0 }
  0x15   : > { %1712 = sst [smem:[#allocation18_spill]] %s1711_s12  ;;  %s271_s15 = sshll.u32 %s1309_s14, 4  ;;  %s1412_s15 = int_to_ptr.vmem [resolvable:$true] %s271_s15 }
  0x16   : > { %p1015_p9 = pneg %p1408_p8  ;;  %s1424_s17 = sadd.s32 1, %s1307_s30  }
  0x17   : > { %1715 = sst [smem:[#allocation19_spill]] %s1424_s17  ;;  %s37_s18 = sadd.s32 1, %s1303_s29 }
  0x18   : > { %p1419_p11 = pnand %p1015_p9, %p1695_p1  ;;  %s34_s19 = ssub.s32 %s1307_s30, %s1424_s17 }
  0x19   : > { %s1716_s6 = sld [smem:[#allocation22_spill]] }
  0x1a   : > { %p1083_p13 = pneg %p1419_p11 }
  0x1f   : > { %s1081_s22 = scalar_lea.hbm %s1716_s6, 2560 }
  0x20   : > { %p1082_p12 = scmp.ne.s32.totalorder %s1716_s6, %s1081_s22  ;;  %p1088_p5 = scmp.lt.u32.totalorder %s1081_s22, %s1716_s6 }
  0x22   : > { %p1084_p0 = pnand %p1083_p13, %p1082_p12 }
  0x24   : > { %p1085_p3 = pneg %p1084_p0 }
  0x26   : > { %p1090_p7 = pnand %p1088_p5, %p1085_p3 }
  0x28   : > { %1093 = shalt.err (!%p1090_p7)
}
  0x29   : > { %s1094_s10 = scalar_lea.vmem %s1412_s15, 2560  ;;  %p1102_p2 = scmp.lt.s32.totalorder %s1412_s15, %s1412_s15 }
  0x2a   : > { %p1095_p9 = scmp.ne.s32.totalorder %s1412_s15, %s1094_s10  ;;  %p1103_p6 = scmp.lt.s32.totalorder %s1094_s10, %s1094_s10 }
  0x2c   : > { %p1097_p10 = pnand %p1095_p9, %p1083_p13  ;;  %p1104_p4 = por %p1103_p6, %p1102_p2 }
  0x2e   : > { %p1098_p1 = pneg %p1097_p10 }
  0x30   : > { %p1105_p8 = pnand %p1104_p4, %p1098_p1 }
  0x32   : > { %1108 = shalt.err (!%p1105_p8)
}
  0x33   : > { %s1310_s14 = smov 128   ;;  %s1311_s20 = smov 8  }
  0x34   : > { %1018 = dma.hbm_to_vmem [thread:$0]  (!%p1419_p11), %s1716_s6, 2560, %s1412_s15, [#allocation9], %s1310_s14, %s1310_s14, %s1311_s20  }
  0x35   : > { %p35_p1 = scmp.eq.s32.totalorder %s34_s19, 0  ;;  %p44_p2 = scmp.ne.s32.totalorder %s1303_s29, %s1299_s28 }
  0x36   : > { %p45_p4 = scmp.eq.s32.totalorder %s1307_s30, 0  ;;  %p1037_p6 = scmp.lt.s32.totalorder %s1307_s30, 2 }
  0x37   : > { %s1455_s23 = scalar_select %p35_p1, %s1303_s29, %s37_s18  }
  0x38   : > { %p46_p8 = por %p45_p4, %p44_p2  ;;  %p1718_p10 = scmp.eq.s32.totalorder %s1389_s9, 1 }
  0x39   : > { %1717 = sst [smem:[#allocation20_spill]] %s1455_s23  ;;  %s1698_s25 = sand.u32 1, %s1303_s29  }
  0x3a   : > { %p1459_p12 = por %p1718_p10, %p44_p2  ;;  %s1465_s26 = sshll.u32 %s1307_s30, 7 }
  0x3b   : > { %s1469_s16 = sshll.u32 %s1698_s25, 3  ;;  %p1471_p11 = pnand %p1037_p6, %p46_p8 }
  0x3c   : > { %s1719_s24 = scalar_select %p1459_p12, 1, 0 }
  0x3d   : > { %s1720_s15 = scalar_select %p1471_p11, 1, 0 }
  0x3e   : > { %s1701_s18 = sand.u32 1, %s1307_s30   ;;  %s1721_s1 = sld [smem:[#allocation21_spill]] }
  0x3f   : > { %s310_s20 = scalar_lea.vmem [#allocation5], %s1469_s16  ;;  %s1487_s22 = scalar_lea.sflag [#allocation6], %s1701_s18 }
  0x40   : > { %s317_s21 = sshll.u32 %s310_s20, 4  ;;  %p1493_p0 = pneg %p1471_p11  ;;  %s1483_s21 = int_to_ptr.vmem [resolvable:$true] %s317_s21 }
  0x44   : > { %s1480_s14 = scalar_lea.hbm %s1721_s1, %s1465_s26  ;;  %s1114_s20 = scalar_lea.hbm %s1721_s1, 256 }
  0x45   : > { %s1109_s25 = scalar_lea.hbm %s1480_s14, 128  ;;  %p1115_p7 = scmp.lt.u32.totalorder %s1480_s14, %s1721_s1 }
  0x46   : > { %p1110_p13 = scmp.ne.s32.totalorder %s1480_s14, %s1109_s25  ;;  %p1116_p9 = scmp.lt.u32.totalorder %s1114_s20, %s1109_s25 }
  0x47   : > { %p1118_p2 = scmp.lt.u32.totalorder %s1109_s25, %s1480_s14 }
  0x48   : > { %p1112_p3 = pnand %p1493_p0, %p1110_p13  ;;  %p1117_p1 = por %p1116_p9, %p1115_p7 }
  0x4a   : > { %p1113_p5 = pneg %p1112_p3  ;;  %p1119_p4 = por %p1118_p2, %p1117_p1 }
  0x4c   : > { %p1120_p6 = pnand %p1119_p4, %p1113_p5 }
  0x4e   : > { %1123 = shalt.err (!%p1120_p6)
}
  0x4f   : > { %s1124_s18 = scalar_lea.vmem %s1483_s21, 128  ;;  %s1312_s19 = smov [#allocation5]  }
  0x50   : > { %p1125_p8 = scmp.ne.s32.totalorder %s1483_s21, %s1124_s18  ;;  %s1129_s10 = sshll.u32 %s1312_s19, 4  ;;  %s1130_s10 = int_to_ptr.vmem [resolvable:$false] %s1129_s10 }
  0x51   : > { %s1131_s17 = scalar_lea.vmem %s1130_s10, 256  ;;  %p1132_p3 = scmp.lt.s32.totalorder %s1483_s21, %s1130_s10 }
  0x52   : > { %p1127_p10 = pnand %p1125_p8, %p1493_p0  ;;  %p1133_p12 = scmp.lt.s32.totalorder %s1131_s17, %s1124_s18 }
  0x54   : > { %p1128_p13 = pneg %p1127_p10  ;;  %p1134_p7 = por %p1133_p12, %p1132_p3 }
  0x56   : > { %p1135_p9 = pnand %p1134_p7, %p1128_p13 }
  0x58   : > { %1138 = shalt.err (!%p1135_p9)
}
  0x59   : > { %1025 = dma.hbm_to_vmem [thread:$0]  (!%p1471_p11), %s1480_s14, 128, %s1483_s21, %s1487_s22  }
  0x5a   : > { %s1521_s20 = scalar_lea.hbm %s1686_s0, %s1465_s26  ;;  %s292_s18 = scalar_lea.vmem [#allocation2], %s1469_s16 }
  0x5b   : > { %s299_s19 = sshll.u32 %s292_s18, 4  ;;  %s1723_s10 = sand.u32 1, %s1303_s29   ;;  %s300_s19 = int_to_ptr.vmem [resolvable:$true] %s299_s19 }
  0x5c   : > { %s289_s17 = scalar_lea.sflag [#allocation3], %s1723_s10  ;;  %s1139_s1 = scalar_lea.hbm %s1521_s20, 128 }
  0x5d   : > { %p1140_p12 = scmp.ne.s32.totalorder %s1521_s20, %s1139_s1  ;;  %s1144_s23 = scalar_lea.hbm %s1686_s0, 256 }
  0x5e   : > { %p1145_p2 = scmp.lt.u32.totalorder %s1521_s20, %s1686_s0  ;;  %p1146_p4 = scmp.lt.u32.totalorder %s1144_s23, %s1139_s1 }
  0x5f   : > { %p1142_p5 = pnand %p1140_p12, %p1493_p0  ;;  %p1148_p8 = scmp.lt.u32.totalorder %s1139_s1, %s1521_s20 }
  0x60   : > { %p1147_p6 = por %p1146_p4, %p1145_p2 }
  0x61   : > { %p1143_p1 = pneg %p1142_p5 }
  0x62   : > { %p1149_p10 = por %p1148_p8, %p1147_p6 }
  0x64   : > { %p1150_p13 = pnand %p1149_p10, %p1143_p1 }
  0x66   : > { %1153 = shalt.err (!%p1150_p13)
}
  0x67   : > { %s1154_s18 = scalar_lea.vmem %s300_s19, 128  ;;  %s1313_s10 = smov [#allocation2]  }
  0x68   : > { %p1155_p3 = scmp.ne.s32.totalorder %s300_s19, %s1154_s18  ;;  %s1159_s29 = sshll.u32 %s1313_s10, 4  ;;  %s1160_s29 = int_to_ptr.vmem [resolvable:$false] %s1159_s29 }
  0x69   : > { %s1161_s14 = scalar_lea.vmem %s1160_s29, 256  ;;  %p1162_p12 = scmp.lt.s32.totalorder %s300_s19, %s1160_s29 }
  0x6a   : > { %p1157_p7 = pnand %p1155_p3, %p1493_p0  ;;  %p1163_p5 = scmp.lt.s32.totalorder %s1161_s14, %s1154_s18 }
  0x6c   : > { %p1158_p9 = pneg %p1157_p7  ;;  %p1164_p11 = por %p1163_p5, %p1162_p12 }
  0x6e   : > { %p1165_p2 = pnand %p1164_p11, %p1158_p9 }
  0x70   : > { %1168 = shalt.err (!%p1165_p2)
}
  0x71   : > { %p1724_p4 = scmp.ne.s32.totalorder %s1720_s15, 0  ;;  %s1547_s21 = scalar_lea.hbm %s1688_s2, %s1465_s26 }
  0x72   : > { %s328_s29 = scalar_lea.vmem [#allocation7], %s1469_s16  ;;  %s1169_s25 = scalar_lea.hbm %s1547_s21, 128 }
  0x73   : > { %1022 = dma.hbm_to_vmem [thread:$0]  (!%p1724_p4), %s1521_s20, 128, %s300_s19, %s289_s17  }
  0x74   : > { %s335_s23 = sshll.u32 %s328_s29, 4  ;;  %p1170_p11 = scmp.ne.s32.totalorder %s1547_s21, %s1169_s25  ;;  %s336_s23 = int_to_ptr.vmem [resolvable:$true] %s335_s23 }
  0x75   : > { %s1174_s20 = scalar_lea.hbm %s1688_s2, 256  ;;  %p1175_p8 = scmp.lt.u32.totalorder %s1547_s21, %s1688_s2 }
  0x76   : > { %p1172_p1 = pnand %p1170_p11, %p1493_p0  ;;  %p1176_p10 = scmp.lt.u32.totalorder %s1174_s20, %s1169_s25 }
  0x77   : > { %p1178_p3 = scmp.lt.u32.totalorder %s1169_s25, %s1547_s21 }
  0x78   : > { %p1173_p6 = pneg %p1172_p1  ;;  %p1177_p13 = por %p1176_p10, %p1175_p8 }
  0x7a   : > { %p1179_p7 = por %p1178_p3, %p1177_p13 }
  0x7c   : > { %p1180_p9 = pnand %p1179_p7, %p1173_p6 }
  0x7e   : > { %1183 = shalt.err (!%p1180_p9)
}
  0x7f   : > { %s1184_s14 = scalar_lea.vmem %s336_s23, 128  ;;  %s1314_s1 = smov [#allocation7]  }
  0x80   : > { %p1185_p12 = scmp.ne.s32.totalorder %s336_s23, %s1184_s14  ;;  %s1189_s12 = sshll.u32 %s1314_s1, 4  ;;  %s1190_s12 = int_to_ptr.vmem [resolvable:$false] %s1189_s12 }
  0x81   : > { %s1191_s29 = scalar_lea.vmem %s1190_s12, 256  ;;  %p1192_p11 = scmp.lt.s32.totalorder %s336_s23, %s1190_s12 }
  0x82   : > { %p1187_p5 = pnand %p1185_p12, %p1493_p0  ;;  %p1193_p1 = scmp.lt.s32.totalorder %s1191_s29, %s1184_s14 }
  0x84   : > { %p1188_p2 = pneg %p1187_p5  ;;  %p1194_p4 = por %p1193_p1, %p1192_p11 }
  0x86   : > { %p1195_p8 = pnand %p1194_p4, %p1188_p2 }
  0x88   : > { %1198 = shalt.err (!%p1195_p8)
}
  0x89   : > { %p1725_p10 = scmp.ne.s32.totalorder %s1720_s15, 0  ;;  %s1572_s10 = scalar_lea.hbm %s1689_s3, %s1465_s26 }
  0x8a   : > { %s346_s20 = scalar_lea.vmem [#allocation8], %s1469_s16  ;;  %s1726_s17 = sand.u32 1, %s1307_s30  }
  0x8b   : > { %1028 = dma.hbm_to_vmem [thread:$0]  (!%p1725_p10), %s1547_s21, 128, %s336_s23, %s1487_s22  }
  0x8c   : > { %s353_s19 = sshll.u32 %s346_s20, 4  ;;  %s343_s14 = scalar_lea.sflag [#allocation9], %s1726_s17  ;;  %s354_s19 = int_to_ptr.vmem [resolvable:$true] %s353_s19 }
  0x8d   : > { %s1199_s1 = scalar_lea.hbm %s1572_s10, 128  ;;  %s1204_s23 = scalar_lea.hbm %s1689_s3, 256 }
  0x8e   : > { %p1200_p4 = scmp.ne.s32.totalorder %s1572_s10, %s1199_s1  ;;  %p1205_p3 = scmp.lt.u32.totalorder %s1572_s10, %s1689_s3 }
  0x8f   : > { %p1206_p7 = scmp.lt.u32.totalorder %s1204_s23, %s1199_s1  ;;  %p1208_p12 = scmp.lt.u32.totalorder %s1199_s1, %s1572_s10 }
  0x90   : > { %p1202_p6 = pnand %p1200_p4, %p1493_p0 }
  0x91   : > { %p1207_p9 = por %p1206_p7, %p1205_p3 }
  0x92   : > { %p1203_p13 = pneg %p1202_p6 }
  0x93   : > { %p1209_p5 = por %p1208_p12, %p1207_p9 }
  0x95   : > { %p1210_p2 = pnand %p1209_p5, %p1203_p13 }
  0x97   : > { %1213 = shalt.err (!%p1210_p2)
}
  0x98   : > { %s1214_s16 = scalar_lea.vmem %s354_s19, 128  ;;  %s1315_s29 = smov [#allocation8]  }
  0x99   : > { %p1215_p11 = scmp.ne.s32.totalorder %s354_s19, %s1214_s16  ;;  %s1219_s25 = sshll.u32 %s1315_s29, 4  ;;  %s1220_s25 = int_to_ptr.vmem [resolvable:$false] %s1219_s25 }
  0x9a   : > { %s1221_s18 = scalar_lea.vmem %s1220_s25, 256  ;;  %p1222_p4 = scmp.lt.s32.totalorder %s354_s19, %s1220_s25 }
  0x9b   : > { %p1217_p1 = pnand %p1215_p11, %p1493_p0  ;;  %p1223_p6 = scmp.lt.s32.totalorder %s1221_s18, %s1214_s16 }
  0x9d   : > { %p1218_p8 = pneg %p1217_p1  ;;  %p1224_p10 = por %p1223_p6, %p1222_p4 }
  0x9f   : > { %p1225_p3 = pnand %p1224_p10, %p1218_p8 }
  0xa1   : > { %1228 = shalt.err (!%p1225_p3)
}
  0xa2   : > { %p1727_p7 = scmp.ne.s32.totalorder %s1720_s15, 0  ;;  %p1728_p13 = scmp.ne.s32.totalorder %s1713_s13, 0 }
  0xa3   : > { %s1597_s6 = sand.u32 (!%p1728_p13), 1, %s1299_s28   ;;  %p1729_p0 = scmp.ne.s32.totalorder (!%p1728_p13), %s1710_s11, 0 }
  0xa4   : > { %1031 = dma.hbm_to_vmem [thread:$0]  (!%p1727_p7), %s1572_s10, 128, %s354_s19, %s343_s14  }
  0xa5   : > { %374 = sbr.rel (%p1728_p13) target bundleno = 758 (0x2f6), region = 52  ;;  %s1600_s20 = sshll.u32 (!%p1728_p13), %s1597_s6, 3 }
  0xa6   : > { %s377_s17 = scalar_lea.sflag (!%p1728_p13), [#allocation3], %s1597_s6  ;;  %s380_s1 = scalar_lea.vmem (!%p1728_p13), [#allocation2], %s1600_s20 }
  0xac   : > { %1274 = dma.done.wait (%p1729_p0), %s377_s17, 128  }
  0xad   : > { %1276 = vsyncadd (%p1729_p0), %s377_s17, 4294967168  ;;  %s385_s13 = sand.u32 1, %s1389_s9   ;;  %s389_s10 = scalar_lea.vmem [#allocation5], %s1600_s20 }
  0xae   : > { %s386_s15 = scalar_lea.sflag [#allocation6], %s385_s13 }
  0xaf   : > { %1278 = dma.done.wait (%p1729_p0), %s386_s15, 256  }
  0xb0   : > { %1280 = vsyncadd (%p1729_p0), %s386_s15, 4294967040  ;;  %s398_s19 = scalar_lea.vmem [#allocation7], %s1600_s20  ;;  %s404_s14 = scalar_lea.sflag [#allocation9], %s385_s13 }
  0xb1   : > { %s407_s22 = scalar_lea.vmem [#allocation8], %s1600_s20 }
  0xb2   : > { %1282 = dma.done.wait (%p1729_p0), %s404_s14, 128  }
  0xb3   : > { %1284 = vsyncadd (%p1729_p0), %s404_s14, 4294967168  ;;  %p1730_p10 = scmp.eq.s32.totalorder %s1389_s9, 0 }
  0xb5   : > { %1286 = dma.done.wait (%p1730_p10), [#allocation9], 2560   ;;  %p1731_p9 = pmov %p1730_p10 }
  0xb6   : > { %p464_p12 = scmp.lt.s32.totalorder %s1389_s9, 1  ;;  %v487_v0 = vlaneseq  ;;  %v1316_v1 = vmov 0.0   ;;  %vm1317_vm0 = vmmov 0   ;;  %v470_v3 = vld [vmem:[%s380_s1] sm:$0xff]  ;;  %v471_v4 = vld [vmem:[%s389_s10] sm:$0xff]  ;;  %vm492_vm3 = vcmask 1040384  }
  0xb7   : > { %1288 = vsyncadd (%p1731_p9), [#allocation9], 4294964736  ;;  %961 = vmatprep.subr.mxu1 %v1316_v1  ;;  %963 = vmatprep.mubr.msk.f32.mxu1 %vm1317_vm0, %v1316_v1  ;;  %v472_v6 = vadd.f32 %v471_v4, %v470_v3  ;;  %v473_v10 = vld [vmem:[%s398_s19] sm:$0xff]  ;;  %v474_v11 = vld [vmem:[%s407_s22] sm:$0xff]  ;;  %vm494_vm4 = vcmask 64512   ;;  %v1318_v21 = vmov 0.0|0.0  }
  0xb8   : > { %s465_s21 = scalar_select %p464_p12, %s1389_s9, 1  ;;  %v488_v2 = vshrl.u32 %v487_v0, 7  ;;  %v475_v14 = vadd.f32 %v474_v11, %v473_v10  ;;  %v664_v18 = vld [vmem:[#allocation10] sm:$0xff]  ;;  %v665_v19 = vld [vmem:[#allocation10 + $0x8] sm:$0xff]  ;;  %v666_v20 = vld [vmem:[#allocation10 + $0x10] sm:$0xff]  ;;  %971 = vmatprep.subr.bf16.mxu0 %v1318_v21  ;;  %vm658_vm5 = vcmask 261120  }
  0xb9   : > { %962 = vmatpush3.msra.mxu1 %v472_v6  ;;  %v972_v22 = vpack.c.bf16 %v665_v19, %v664_v18  ;;  %v667_v23 = vld [vmem:[#allocation10 + $0x18] sm:$0xff]  ;;  %v668_v25 = vld [vmem:[#allocation10 + $0x20] sm:$0xff]  ;;  %v669_v26 = vld [vmem:[#allocation10 + $0x28] sm:$0xff]  ;;  %s1319_s25 = smov 32   ;;  %s1320_s18 = smov 96   ;;  %vm660_vm6 = vcmask 523264  }
  0xba   : > { %s466_s11 = scalar_lea.vmem %s1690_s4, %s465_s21  ;;  %s469_s29 = scalar_lea.vmem %s1691_s5, %s465_s21  ;;  %v489_v7 = vsub.s32 0, %v488_v2  ;;  %966 = vmatprep.subr.mxu1 %v1316_v1  ;;  %v975_v24 = vpack.c.bf16 %v667_v23, %v666_v20  ;;  %v978_v27 = vpack.c.bf16 %v669_v26, %v668_v25  ;;  %v670_v28 = vld [vmem:[#allocation10 + $0x30] sm:$0xff]  ;;  %v671_v29 = vld [vmem:[#allocation10 + $0x38] sm:$0xff]  ;;  %v672_v31 = vld [vmem:[#allocation10 + $0x40] sm:$0xff]  ;;  %vm662_vm7 = vcmask 785408  }
  0xbb   : > { %v476_v5 = vld [vmem:[%s466_s11] sm:$0x1]  ;;  %973 = vmatpush1.bf16.msra.mxu0 %v972_v22  ;;  %v981_v30 = vpack.c.bf16 %v671_v29, %v670_v28  ;;  %v673_v32 = vld [vmem:[#allocation10 + $0x48] sm:$0xff]  ;;  %v674_v34 = vld [vmem:[#allocation10 + $0x50] sm:$0xff]  ;;  %s1321_s20 = smov 64   ;;  %s954_s13 = sshll.u32 %s1389_s9, 4 }
  0xbc   : > { %vm477_vm1 = vcmp.eq.s32.totalorder %v476_v5, 1  ;;  %v481_v8 = vld [vmem:[%s469_s29] sm:$0x1]  ;;  %974 = vmatprep.subr.bf16.mxu0 %v1318_v21  ;;  %v984_v33 = vpack.c.bf16 %v673_v32, %v672_v31  ;;  %v675_v35 = vld [vmem:[#allocation10 + $0x58] sm:$0xff]  ;;  %v677_v38 = vld [vmem:[#allocation10 + $0x68] sm:$0xff]  ;;  %s463_s15 = scalar_lea.vmem [#allocation11], %s1597_s6  ;;  %s1642_s22 = scalar_lea.hbm %s1694_s8, %s954_s13 }
  0xbd   : > { %v949_v9 = vsel %vm477_vm1, 1.0, %v1316_v1  ;;  %vm482_vm2 = vcmp.eq.s32.totalorder %v481_v8, 3  ;;  %v987_v36 = vpack.c.bf16 %v675_v35, %v674_v34  ;;  %v676_v37 = vld [vmem:[#allocation10 + $0x60] sm:$0xff]  ;;  %v678_v40 = vld [vmem:[#allocation10 + $0x70] sm:$0xff]  ;;  %v679_v41 = vld [vmem:[#allocation10 + $0x78] sm:$0xff]  ;;  %s772_s10 = sshll.u32 %s463_s15, 4  ;;  %s1644_s10 = int_to_ptr.vmem [resolvable:$true] %s772_s10 }
  0xbe   : > { %v480_v12 = vmul.f32 0.0625, %v949_v9  ;;  %v950_v15 = vsel %vm482_vm2, 1.0, %v1316_v1  ;;  %v990_v39 = vpack.c.bf16 %v677_v38, %v676_v37  ;;  %v993_v42 = vpack.c.bf16 %v679_v41, %v678_v40  ;;  %v680_v43 = vld [vmem:[#allocation10 + $0x80] sm:$0xff]  ;;  %v681_v44 = vld [vmem:[#allocation10 + $0x88] sm:$0xff]  ;;  %v682_v46 = vld [vmem:[#allocation10 + $0x90] sm:$0xff]  ;;  %s760_s21 = scalar_lea.sflag [#allocation4], %s1597_s6 }
  0xbf   : > { %v485_v17 = vmul.f32 0.0625, %v950_v15  ;;  %976 = vmatpush1.bf16.msra.mxu0 %v975_v24  ;;  %v996_v45 = vpack.c.bf16 %v681_v44, %v680_v43  ;;  %v683_v47 = vld [vmem:[#allocation10 + $0x98] sm:$0xff]  ;;  %v684_v63 = vld [vmem:[%s1693_s7] sm:$0x1]  ;;  %s1229_s23 = scalar_lea.vmem %s1644_s10, 16  ;;  %p1732_p2 = scmp.ne.s32.totalorder %s1719_s24, 0 }
  0xc0   : > { %v490_v13 = vrot.slane %v480_v12, %v489_v7  ;;  %977 = vmatprep.subr.bf16.mxu0 %v1318_v21  ;;  %v999_v48 = vpack.c.bf16 %v683_v47, %v682_v46  ;;  %p1230_p5 = scmp.ne.s32.totalorder %s1644_s10, %s1229_s23  ;;  %s1322_s9 = smov [#allocation11]  }
  0xc1   : > { %s1233_s26 = sshll.u32 %s1322_s9, 4  ;;  %s1234_s26 = int_to_ptr.vmem [resolvable:$false] %s1233_s26 }
  0xc2   : > { %v493_v16 = vsel %vm492_vm3, 0.0625, %v490_v13  ;;  %p1231_p11 = pnand %p1230_p5, %p1732_p2  ;;  %s1235_s11 = scalar_lea.vmem %s1234_s26, 32 }
  0xc3   : > { %964 = vmatmul.mubr.msk.f32.vlgmr.msra.gmra.mrb[0].mxu1 %vm494_vm4, %v493_v16  ;;  %979 = vmatpush1.bf16.msra.mxu0 %v978_v27  ;;  %p1236_p8 = scmp.lt.s32.totalorder %s1644_s10, %s1234_s26  ;;  %p1237_p4 = scmp.lt.s32.totalorder %s1235_s11, %s1229_s23 }
  0xc4   : > { %967 = vmatpush3.msra.mxu1 %v475_v14  ;;  %968 = vmatprep.mubr.msk.f32.mxu1 %vm1317_vm0, %v1316_v1  ;;  %p1232_p1 = pneg %p1231_p11 }
  0xc5   : > { %980 = vmatprep.subr.bf16.mxu0 %v1318_v21  ;;  %p1238_p6 = por %p1237_p4, %p1236_p8 }
  0xc7   : > { %969 = vmatmul.mubr.msk.f32.vlgmr.msra.gmra.mrb[2].mxu1 %vm494_vm4, %v485_v17  ;;  %982 = vmatpush1.bf16.msra.mxu0 %v981_v30  ;;  %p1239_p3 = pnand %p1238_p6, %p1232_p1 }
  0xc8   : > { %983 = vmatprep.subr.bf16.mxu0 %v1318_v21 }
  0xcb   : > { %985 = vmatpush1.bf16.msra.mxu0 %v984_v33 }
  0xcc   : > { %986 = vmatprep.subr.bf16.mxu0 %v1318_v21 }
  0xcf   : > { %988 = vmatpush1.bf16.msra.mxu0 %v987_v36 }
  0xd0   : > { %989 = vmatprep.subr.bf16.mxu0 %v1318_v21 }
  0xd3   : > { %991 = vmatpush1.bf16.msra.mxu0 %v990_v39 }
  0xd4   : > { %992 = vmatprep.subr.bf16.mxu0 %v1318_v21 }
  0xd7   : > { %994 = vmatpush1.bf16.msra.mxu0 %v993_v42 }
  0xd8   : > { %995 = vmatprep.subr.bf16.mxu0 %v1318_v21 }
  0xdb   : > { %997 = vmatpush1.bf16.msra.mxu0 %v996_v45 }
  0xdc   : > { %998 = vmatprep.subr.bf16.mxu0 %v1318_v21 }
  0xdf   : > { %1000 = vmatpush1.bf16.msra.mxu0 %v999_v48 }
 0x196   : > { %v564_v49 = vpop.f32.mrb[0].mxu1 }
 0x197   : > { %v965_v50 = vpop.f32.mrb[1].mxu1  ;;  %v642_v51 = vrot.slane %v564_v49, 1 }
 0x199   : > { %647 = vrot.lane.b32.xlu0 %v642_v51, %s1319_s25  ;;  %v646_v52 = vmul.f32 %v642_v51, %v564_v49  ;;  %v644_v53 = vsub.f32 %v564_v49, %v642_v51 }
 0x19a   : > { %v637_v54 = vpop.f32.mrb[2].mxu1 }
 0x19b   : > { %655 = vrot.lane.b32.xlu1 %v646_v52, %s1320_s18  ;;  %v645_v55 = vand.u32 2147483647, %v644_v53  ;;  %v970_v56 = vpop.f32.mrb[3].mxu1  ;;  %953 = vmatprep.mubr.msk.f32.mxu0 %vm658_vm5, %v637_v54 }
 0x19d   : > { %651 = vrot.lane.b32.xlu0 %v645_v55, %s1321_s20 }
 0x20b   : > { %v648_v57 = vpop.permute.xlu0 %647 }
 0x20c   : > { %v659_v59 = vsel %vm658_vm5, %v564_v49, %v648_v57 }
 0x20d   : > { %v656_v60 = vpop.permute.xlu1 %655 }
 0x20f   : > { %v652_v58 = vpop.permute.xlu0 %651 }
 0x210   : > { %v661_v61 = vsel %vm660_vm6, %v659_v59, %v652_v58 }
 0x211   : > { %v663_v62 = vsel %vm662_vm7, %v661_v61, %v656_v60 }
 0x212   : > { %753 = vmatmul.mubr.f32.vlgmr.msra.gmra.mrb[0].mxu0 %v663_v62 }
 0x2e5   : > { %v754_v0 = vpop.f32.mrb[0].mxu0 }
 0x2e6   : > { %v755_v1 = vadd.f32 %v754_v0, %v684_v63  ;;  %v756_v2 = vpop.f32.mrb[1].mxu0 }
 0x2e8   : > { %758 = vst [vmem:[%s463_s15] sm:$0x1] %v755_v1 }
 0x2e9   : > { %1242 = shalt.err (!%p1239_p3)
}
 0x2ea   : > { %s1243_s6 = scalar_lea.hbm %s1642_s22, 16  ;;  %s1247_s29 = scalar_lea.hbm %s1694_s8, 32 }
 0x2eb   : > { %p1244_p7 = scmp.ne.s32.totalorder %s1642_s22, %s1243_s6  ;;  %p1248_p10 = scmp.lt.u32.totalorder %s1642_s22, %s1694_s8 }
 0x2ec   : > { %p1249_p9 = scmp.lt.u32.totalorder %s1247_s29, %s1243_s6  ;;  %p1251_p5 = scmp.lt.u32.totalorder %s1243_s6, %s1642_s22 }
 0x2ed   : > { %p1245_p13 = pnand %p1244_p7, %p1732_p2 }
 0x2ee   : > { %p1250_p12 = por %p1249_p9, %p1248_p10 }
 0x2ef   : > { %p1246_p0 = pneg %p1245_p13 }
 0x2f0   : > { %p1252_p11 = por %p1251_p5, %p1250_p12 }
 0x2f2   : > { %p1253_p1 = pnand %p1252_p11, %p1246_p0 }
 0x2f4   : > { %1256 = shalt.err (!%p1253_p1)
}
 0x2f5   : > { %1013 = dma.vmem_to_hbm [thread:$0]  (%p1732_p2), %s1644_s10, 16, %s1642_s22, %s760_s21  }
 0x2f6 PF: > { %s1733_s20 = sld [smem:[#allocation18_spill]]  ;;  %s784_s17 = sand.u32 1, %s1295_s27  }
 0x2f7   : > { %p1735_p4 = scmp.ge.s32.totalorder %s1307_s30, 2  ;;  %s785_s1 = scalar_lea.sflag [#allocation4], %s784_s17 }
 0x2fc   : > { %p1734_p8 = scmp.ne.s32.totalorder %s1733_s20, 0 }
 0x2fe   : > { %p1033_p6 = pnand %p1735_p4, %p1734_p8 }
 0x300   : > { %1290 = dma.done.wait (!%p1033_p6), %s785_s1, 16  }
 0x301   : > { %1292 = vsyncadd (!%p1033_p6), %s785_s1, 4294967280  ;;  %s1736_s30 = sld [smem:[#allocation19_spill]]  ;;  %s1737_s13 = sld [smem:[#allocation17_spill]] }
 0x302   : > { %s1738_s29 = sld [smem:[#allocation20_spill]]  ;;  %s1739_s27 = smov %s1299_s28 }
 0x307   : > { %p27_p3 = scmp.ge.s32.totalorder %s1736_s30, 4   ;;  %s1740_s28 = smov %s1737_s13 }
 0x309   :  { %29 = sbr.rel (!%p27_p3) target bundleno = 12 (0xc), region = 144 }
 0x310   :  { %789 = vsyncpa [#allocation3], 1 }
 0x311   :  { %791 = vsyncpa [#allocation3 + $0x1], 1 }
 0x312   :  { %792 = vsyncpa [#allocation6], 1 }
 0x313   :  { %794 = vsyncpa [#allocation6 + $0x1], 1 }
 0x314   :  { %795 = vsyncpa [#allocation9], 1 }
 0x315   :  { %797 = vsyncpa [#allocation9 + $0x1], 1 }
 0x316   :  { %798 = vsyncpa [#allocation4], 1 }
 0x317   :  { %800 = vsyncpa [#allocation4 + $0x1], 1 }

</bundles_post_ra>
